<compile_context>
chip_gen: v7x
topology: tpu7x:2x2x1
jax: 0.10.0
libtpu: 0.0.40
codegen_flags: <defaults>
</compile_context>

<pallas_src>
import functools
import math

import jax
import jax.numpy as jnp
from jax.experimental import pallas as pl
from jax.experimental.pallas import tpu as pltpu

LANE = 128
VEC_ROWS = 16              # 10 packed vectors, rounded up to a full (8,128) pair
_LN_EPS = 1e-5             # PyTorch nn.LayerNorm default

# Row layout of the packed (VEC_ROWS, 128) vector operand.
_B0 = 0
_G1, _BE1, _B1 = 1, 2, 3
_G2, _BE2, _B2 = 4, 5, 6
_G3, _BE3, _B3 = 7, 8, 9


def _dpb_kernel(x_ref, w_ref, v_ref, o_ref, *, pos_dim, residual):
    # x_ref : (tile_m, 128)    biases padded to 128 lanes (lanes >= 2 are 0)
    # w_ref : (4, 128, 128)    stacked zero-padded weights (in, out), f32 or bf16
    # v_ref : (16, 128)        packed zero-padded biases / LN gamma / LN beta, f32
    # o_ref : (tile_m, 128)    lane-dense output; first num_heads lanes valid
    x = x_ref[...]
    inv_d = 1.0 / float(pos_dim)
    lane = jax.lax.broadcasted_iota(jnp.int32, (1, LANE), 1)
    mask = (lane < pos_dim).astype(jnp.float32)          # valid-lane mask

    def vec(r):                                          # static slice -> (1,128)
        return v_ref[r:r + 1, :]

    def linear(y_f32, k, b_row):
        w = w_ref[k]                                     # (128,128), maybe bf16
        y = y_f32.astype(w.dtype)                        # cast only at the dot
        return jnp.dot(y, w, preferred_element_type=jnp.float32) + vec(b_row)

    def ln_relu_linear(h, g_row, be_row, k, b_row):
        # LayerNorm over the first pos_dim lanes (padded lanes of h are 0).
        mean = jnp.sum(h, axis=-1, keepdims=True) * inv_d
        d = (h - mean) * mask
        var = jnp.sum(d * d, axis=-1, keepdims=True) * inv_d
        xn = (h - mean) * jax.lax.rsqrt(var + _LN_EPS)
        y = xn * vec(g_row) + vec(be_row)                # padded gamma/beta = 0
        y = jnp.maximum(y, 0.0)                          # ReLU
        return linear(y, k, b_row)

    # pos_proj
    pos = linear(x, 0, _B0)

    if residual:
        pos = pos + ln_relu_linear(pos, _G1, _BE1, 1, _B1)
        pos = pos + ln_relu_linear(pos, _G2, _BE2, 2, _B2)
        pos = ln_relu_linear(pos, _G3, _BE3, 3, _B3)
    else:
        pos = ln_relu_linear(pos, _G1, _BE1, 1, _B1)
        pos = ln_relu_linear(pos, _G2, _BE2, 2, _B2)
        pos = ln_relu_linear(pos, _G3, _BE3, 3, _B3)

    o_ref[...] = pos.astype(o_ref.dtype)


def _pad2(a, rows, cols):
    return jnp.pad(a, ((0, rows - a.shape[0]), (0, cols - a.shape[1])))


def prepare_dpb_params(params, weight_dtype=jnp.float32):
    """Pad/pack all module parameters ONCE; cache the result and reuse per call.

    weight_dtype=jnp.bfloat16 halves weight DMA and feeds the MXU native bf16
    on v6e/v7x; LN/ReLU math in the kernel stays f32 regardless.
    """
    pos_dim = params["w0"].shape[1]
    num_heads = params["w3"].shape[1]
    assert pos_dim <= LANE and num_heads <= LANE

    def pw(a):
        return _pad2(jnp.asarray(a, jnp.float32), LANE, LANE)

    w_stack = jnp.stack(
        [pw(params["w0"]), pw(params["w1"]), pw(params["w2"]), pw(params["w3"])]
    ).astype(weight_dtype)                               # (4,128,128)

    def pv(a):
        return _pad2(jnp.asarray(a, jnp.float32).reshape(1, -1), 1, LANE)

    rows = [params["b0"],
            params["g1"], params["be1"], params["b1"],
            params["g2"], params["be2"], params["b2"],
            params["g3"], params["be3"], params["b3"]]
    v_pack = jnp.concatenate(
        [pv(r) for r in rows]
        + [jnp.zeros((VEC_ROWS - len(rows), LANE), jnp.float32)], axis=0)  # (16,128)

    return dict(w=w_stack, v=v_pack, pos_dim=pos_dim, num_heads=num_heads)


def dynamic_pos_bias_pallas(biases, packed, *, residual=False, tile_m=1024,
                            unpad=True):
    """biases: (N, 2) relative coords; packed: output of prepare_dpb_params.

    Returns (N, num_heads) if unpad else the padded lane-dense (n_pad, 128)
    table (first num_heads lanes valid) — the latter avoids an extra slice
    launch when the consumer indexes lanes itself.
    """
    N, in_dim = biases.shape
    assert in_dim <= LANE
    pos_dim = packed["pos_dim"]
    num_heads = packed["num_heads"]

    # Cap tile_m so the large-N fallback stays well inside v7x's 32 MiB scoped
    # VMEM (in+out double-buffered ~= 4*tile_m*128*4 B + ~0.3 MiB params).
    tile_m = min(tile_m, 4096)

    n_pad = ((N + 7) // 8) * 8
    if n_pad <= tile_m:
        tile_m = n_pad                        # single resident grid step
    else:
        n_pad = pl.cdiv(N, tile_m) * tile_m   # 'parallel' tiled fallback
    grid = (n_pad // tile_m,)

    f32 = jnp.float32
    x_p = jnp.pad(biases.astype(f32), ((0, n_pad - N), (0, LANE - in_dim)))

    out = pl.pallas_call(
        functools.partial(_dpb_kernel, pos_dim=pos_dim, residual=residual),
        out_shape=jax.ShapeDtypeStruct((n_pad, LANE), f32),
        grid_spec=pl.GridSpec(
            grid=grid,
            in_specs=[
                pl.BlockSpec((tile_m, LANE), lambda i: (i, 0)),
                pl.BlockSpec((4, LANE, LANE), lambda i: (0, 0, 0)),
                pl.BlockSpec((VEC_ROWS, LANE), lambda i: (0, 0)),
            ],
            out_specs=pl.BlockSpec((tile_m, LANE), lambda i: (i, 0)),
        ),
        compiler_params=pltpu.CompilerParams(
            dimension_semantics=("parallel",)),
    )(x_p, packed["w"], packed["v"])

    if unpad:
        return out[:N, :num_heads]
    return out


def dynamic_pos_bias_reference(biases, params, *, residual=False):
    """Plain-JAX reference matching the PyTorch DynamicPosBias forward."""
    hp = jax.lax.Precision.HIGHEST

    def ln(x, g, b):
        mean = jnp.mean(x, axis=-1, keepdims=True)
        var = jnp.mean((x - mean) ** 2, axis=-1, keepdims=True)
        return (x - mean) / jnp.sqrt(var + _LN_EPS) * g + b

    def block(x, g, be, w, b):
        return jnp.dot(jnp.maximum(ln(x, g, be), 0.0), w, precision=hp) + b

    pos = jnp.dot(biases, params["w0"], precision=hp) + params["b0"]
    if residual:
        pos = pos + block(pos, params["g1"], params["be1"], params["w1"], params["b1"])
        pos = pos + block(pos, params["g2"], params["be2"], params["w2"], params["b2"])
        pos = block(pos, params["g3"], params["be3"], params["w3"], params["b3"])
    else:
        pos = block(pos, params["g1"], params["be1"], params["w1"], params["b1"])
        pos = block(pos, params["g2"], params["be2"], params["w2"], params["b2"])
        pos = block(pos, params["g3"], params["be3"], params["w3"], params["b3"])
    return pos


if __name__ == "__main__":
    # Module config (synthetic, deterministic init): DynamicPosBias(dim=32, heads=4)
    dim = 32
    num_heads = 4
    pos_dim = dim // 4          # 8
    Gh = Gw = 4                 # group size -> (2*4-1)^2 = 49 relative offsets

    key = jax.random.PRNGKey(0)
    keys = jax.random.split(key, 14)

    def linear_init(kw, kb, fan_in, fan_out):
        lim = 1.0 / math.sqrt(fan_in)
        wgt = jax.random.uniform(kw, (fan_in, fan_out), minval=-lim, maxval=lim,
                                 dtype=jnp.float32)
        bia = jax.random.uniform(kb, (fan_out,), minval=-lim, maxval=lim,
                                 dtype=jnp.float32)
        return wgt, bia

    w0, b0 = linear_init(keys[0], keys[1], 2, pos_dim)
    w1, b1 = linear_init(keys[2], keys[3], pos_dim, pos_dim)
    w2, b2 = linear_init(keys[4], keys[5], pos_dim, pos_dim)
    w3, b3 = linear_init(keys[6], keys[7], pos_dim, num_heads)

    def ln_init(kg, kb, d):
        g = 1.0 + 0.1 * jax.random.normal(kg, (d,), dtype=jnp.float32)
        b = 0.1 * jax.random.normal(kb, (d,), dtype=jnp.float32)
        return g, b

    g1, be1 = ln_init(keys[8], keys[9], pos_dim)
    g2, be2 = ln_init(keys[10], keys[11], pos_dim)
    g3, be3 = ln_init(keys[12], keys[13], pos_dim)

    params = dict(w0=w0, b0=b0,
                  g1=g1, be1=be1, w1=w1, b1=b1,
                  g2=g2, be2=be2, w2=w2, b2=b2,
                  g3=g3, be3=be3, w3=w3, b3=b3)

    # Relative-position coordinate table, as built in CrossFormer's Attention
    coords_h = jnp.arange(1 - Gh, Gh, dtype=jnp.float32)
    coords_w = jnp.arange(1 - Gw, Gw, dtype=jnp.float32)
    bias_grid = jnp.stack(jnp.meshgrid(coords_h, coords_w, indexing="ij"), axis=0)
    biases = bias_grid.reshape(2, -1).T        # (49, 2)

    # Pad/pack params ONCE (the hoist recommended by the review), reuse below.
    packed_f32 = prepare_dpb_params(params, weight_dtype=jnp.float32)
    packed_bf16 = prepare_dpb_params(params, weight_dtype=jnp.bfloat16)

    ok = True
    for residual in (False, True):
        ref = dynamic_pos_bias_reference(biases, params, residual=residual)

        out = jax.block_until_ready(
            dynamic_pos_bias_pallas(biases, packed_f32, residual=residual))
        assert out.shape == (biases.shape[0], num_heads)
        if not jnp.allclose(out, ref, atol=1e-3, rtol=1e-3):
            ok = False
            print(f"f32 mismatch (residual={residual}): "
                  f"max abs err = {jnp.max(jnp.abs(out - ref))}")

        # bf16-weight path (v6e/v7x): looser tolerance, weights are bf16.
        out_bf = jax.block_until_ready(
            dynamic_pos_bias_pallas(biases, packed_bf16, residual=residual))
        if not jnp.allclose(out_bf, ref, atol=5e-2, rtol=5e-2):
            ok = False
            print(f"bf16 mismatch (residual={residual}): "
                  f"max abs err = {jnp.max(jnp.abs(out_bf - ref))}")

    assert ok, "mismatch vs reference"
    print("KERNEL_OK")
</pallas_src>

<mosaic_0001>
module attributes {stable_mosaic.version = 11 : i64} {
  func.func @_dpb_kernel(%arg0: i32, %arg1: memref<56x128xf32, #tpu.memory_space<vmem>>, %arg2: memref<4x128x128xf32, #tpu.memory_space<vmem>>, %arg3: memref<16x128xf32, #tpu.memory_space<vmem>>, %arg4: memref<56x128xf32, #tpu.memory_space<vmem>>) attributes {dimension_semantics = [#tpu.dimension_semantics<parallel>], iteration_bounds = array<i64: 1>, scalar_prefetch = 0 : i64, scratch_operands = 0 : i64, tpu.core_type = #tpu.core_type<tc>, window_params = [{transform_indices = @transform_0, window_bounds = array<i64: 56, 128>}, {pipeline_mode = #tpu.pipeline_mode<synchronous>, transform_indices = @transform_1, window_bounds = array<i64: 4, 128, 128>}, {pipeline_mode = #tpu.pipeline_mode<synchronous>, transform_indices = @transform_2, window_bounds = array<i64: 16, 128>}, {transform_indices = @transform_3, window_bounds = array<i64: 56, 128>}]} {
    %c0 = arith.constant 0 : index
    %c0_0 = arith.constant 0 : index
    %0 = vector.load %arg1[%c0, %c0_0] : memref<56x128xf32, #tpu.memory_space<vmem>>, vector<56x128xf32>
    %1 = tpu.iota {dimensions = array<i32: 1>} : vector<1x128xi32>
    %c8_i32 = arith.constant 8 : i32
    %2 = vector.broadcast %c8_i32 : i32 to vector<1x128xi32>
    %3 = arith.cmpi slt, %1, %2 : vector<1x128xi32>
    %4 = arith.extui %3 : vector<1x128xi1> to vector<1x128xi32>
    %5 = arith.sitofp %4 : vector<1x128xi32> to vector<1x128xf32>
    %c0_1 = arith.constant 0 : index
    %c0_2 = arith.constant 0 : index
    %c0_3 = arith.constant 0 : index
    %6 = vector.load %arg2[%c0_1, %c0_2, %c0_3] : memref<4x128x128xf32, #tpu.memory_space<vmem>>, vector<1x128x128xf32>
    %7 = vector.shape_cast %6 : vector<1x128x128xf32> to vector<128x128xf32>
    %cst = arith.constant dense<0.000000e+00> : vector<56x128xf32>
    %8 = tpu.matmul %0, %7, %cst {dimension_numbers = #tpu.dot_dimension_numbers<[1], [0], [0], [1], [0, 0, 1, 1], [], []>} : vector<56x128xf32>, vector<128x128xf32>, vector<56x128xf32> -> vector<56x128xf32>
    %c0_4 = arith.constant 0 : index
    %c0_5 = arith.constant 0 : index
    %9 = vector.load %arg3[%c0_4, %c0_5] : memref<16x128xf32, #tpu.memory_space<vmem>>, vector<1x128xf32>
    %10 = vector.broadcast %9 : vector<1x128xf32> to vector<56x128xf32>
    %11 = arith.addf %8, %10 : vector<56x128xf32>
    %cst_6 = arith.constant dense<0.000000e+00> : vector<56xf32>
    %12 = vector.multi_reduction <add>, %11, %cst_6 [1] : vector<56x128xf32> to vector<56xf32>
    %13 = vector.shape_cast %12 : vector<56xf32> to vector<56x1xf32>
    %cst_7 = arith.constant 1.250000e-01 : f32
    %14 = vector.broadcast %cst_7 : f32 to vector<56x1xf32>
    %15 = arith.mulf %13, %14 : vector<56x1xf32>
    %16 = vector.broadcast %15 : vector<56x1xf32> to vector<56x128xf32>
    %17 = arith.subf %11, %16 : vector<56x128xf32>
    %18 = vector.broadcast %5 : vector<1x128xf32> to vector<56x128xf32>
    %19 = arith.mulf %17, %18 : vector<56x128xf32>
    %20 = arith.mulf %19, %19 : vector<56x128xf32>
    %cst_8 = arith.constant dense<0.000000e+00> : vector<56xf32>
    %21 = vector.multi_reduction <add>, %20, %cst_8 [1] : vector<56x128xf32> to vector<56xf32>
    %22 = vector.shape_cast %21 : vector<56xf32> to vector<56x1xf32>
    %cst_9 = arith.constant 1.250000e-01 : f32
    %23 = vector.broadcast %cst_9 : f32 to vector<56x1xf32>
    %24 = arith.mulf %22, %23 : vector<56x1xf32>
    %25 = vector.broadcast %15 : vector<56x1xf32> to vector<56x128xf32>
    %26 = arith.subf %11, %25 : vector<56x128xf32>
    %cst_10 = arith.constant 9.99999974E-6 : f32
    %27 = vector.broadcast %cst_10 : f32 to vector<56x1xf32>
    %28 = arith.addf %24, %27 : vector<56x1xf32>
    %29 = math.rsqrt %28 : vector<56x1xf32>
    %30 = vector.broadcast %29 : vector<56x1xf32> to vector<56x128xf32>
    %31 = arith.mulf %26, %30 : vector<56x128xf32>
    %c1 = arith.constant 1 : index
    %c0_11 = arith.constant 0 : index
    %32 = vector.load %arg3[%c1, %c0_11] : memref<16x128xf32, #tpu.memory_space<vmem>>, vector<1x128xf32>
    %33 = vector.broadcast %32 : vector<1x128xf32> to vector<56x128xf32>
    %34 = arith.mulf %31, %33 : vector<56x128xf32>
    %c2 = arith.constant 2 : index
    %c0_12 = arith.constant 0 : index
    %35 = vector.load %arg3[%c2, %c0_12] : memref<16x128xf32, #tpu.memory_space<vmem>>, vector<1x128xf32>
    %36 = vector.broadcast %35 : vector<1x128xf32> to vector<56x128xf32>
    %37 = arith.addf %34, %36 : vector<56x128xf32>
    %cst_13 = arith.constant 0.000000e+00 : f32
    %38 = vector.broadcast %cst_13 : f32 to vector<56x128xf32>
    %39 = arith.maximumf %37, %38 : vector<56x128xf32>
    %c1_14 = arith.constant 1 : index
    %c0_15 = arith.constant 0 : index
    %c0_16 = arith.constant 0 : index
    %40 = vector.load %arg2[%c1_14, %c0_15, %c0_16] : memref<4x128x128xf32, #tpu.memory_space<vmem>>, vector<1x128x128xf32>
    %41 = vector.shape_cast %40 : vector<1x128x128xf32> to vector<128x128xf32>
    %cst_17 = arith.constant dense<0.000000e+00> : vector<56x128xf32>
    %42 = tpu.matmul %39, %41, %cst_17 {dimension_numbers = #tpu.dot_dimension_numbers<[1], [0], [0], [1], [0, 0, 1, 1], [], []>} : vector<56x128xf32>, vector<128x128xf32>, vector<56x128xf32> -> vector<56x128xf32>
    %c3 = arith.constant 3 : index
    %c0_18 = arith.constant 0 : index
    %43 = vector.load %arg3[%c3, %c0_18] : memref<16x128xf32, #tpu.memory_space<vmem>>, vector<1x128xf32>
    %44 = vector.broadcast %43 : vector<1x128xf32> to vector<56x128xf32>
    %45 = arith.addf %42, %44 : vector<56x128xf32>
    %cst_19 = arith.constant dense<0.000000e+00> : vector<56xf32>
    %46 = vector.multi_reduction <add>, %45, %cst_19 [1] : vector<56x128xf32> to vector<56xf32>
    %47 = vector.shape_cast %46 : vector<56xf32> to vector<56x1xf32>
    %cst_20 = arith.constant 1.250000e-01 : f32
    %48 = vector.broadcast %cst_20 : f32 to vector<56x1xf32>
    %49 = arith.mulf %47, %48 : vector<56x1xf32>
    %50 = vector.broadcast %49 : vector<56x1xf32> to vector<56x128xf32>
    %51 = arith.subf %45, %50 : vector<56x128xf32>
    %52 = vector.broadcast %5 : vector<1x128xf32> to vector<56x128xf32>
    %53 = arith.mulf %51, %52 : vector<56x128xf32>
    %54 = arith.mulf %53, %53 : vector<56x128xf32>
    %cst_21 = arith.constant dense<0.000000e+00> : vector<56xf32>
    %55 = vector.multi_reduction <add>, %54, %cst_21 [1] : vector<56x128xf32> to vector<56xf32>
    %56 = vector.shape_cast %55 : vector<56xf32> to vector<56x1xf32>
    %cst_22 = arith.constant 1.250000e-01 : f32
    %57 = vector.broadcast %cst_22 : f32 to vector<56x1xf32>
    %58 = arith.mulf %56, %57 : vector<56x1xf32>
    %59 = vector.broadcast %49 : vector<56x1xf32> to vector<56x128xf32>
    %60 = arith.subf %45, %59 : vector<56x128xf32>
    %cst_23 = arith.constant 9.99999974E-6 : f32
    %61 = vector.broadcast %cst_23 : f32 to vector<56x1xf32>
    %62 = arith.addf %58, %61 : vector<56x1xf32>
    %63 = math.rsqrt %62 : vector<56x1xf32>
    %64 = vector.broadcast %63 : vector<56x1xf32> to vector<56x128xf32>
    %65 = arith.mulf %60, %64 : vector<56x128xf32>
    %c4 = arith.constant 4 : index
    %c0_24 = arith.constant 0 : index
    %66 = vector.load %arg3[%c4, %c0_24] : memref<16x128xf32, #tpu.memory_space<vmem>>, vector<1x128xf32>
    %67 = vector.broadcast %66 : vector<1x128xf32> to vector<56x128xf32>
    %68 = arith.mulf %65, %67 : vector<56x128xf32>
    %c5 = arith.constant 5 : index
    %c0_25 = arith.constant 0 : index
    %69 = vector.load %arg3[%c5, %c0_25] : memref<16x128xf32, #tpu.memory_space<vmem>>, vector<1x128xf32>
    %70 = vector.broadcast %69 : vector<1x128xf32> to vector<56x128xf32>
    %71 = arith.addf %68, %70 : vector<56x128xf32>
    %cst_26 = arith.constant 0.000000e+00 : f32
    %72 = vector.broadcast %cst_26 : f32 to vector<56x128xf32>
    %73 = arith.maximumf %71, %72 : vector<56x128xf32>
    %c2_27 = arith.constant 2 : index
    %c0_28 = arith.constant 0 : index
    %c0_29 = arith.constant 0 : index
    %74 = vector.load %arg2[%c2_27, %c0_28, %c0_29] : memref<4x128x128xf32, #tpu.memory_space<vmem>>, vector<1x128x128xf32>
    %75 = vector.shape_cast %74 : vector<1x128x128xf32> to vector<128x128xf32>
    %cst_30 = arith.constant dense<0.000000e+00> : vector<56x128xf32>
    %76 = tpu.matmul %73, %75, %cst_30 {dimension_numbers = #tpu.dot_dimension_numbers<[1], [0], [0], [1], [0, 0, 1, 1], [], []>} : vector<56x128xf32>, vector<128x128xf32>, vector<56x128xf32> -> vector<56x128xf32>
    %c6 = arith.constant 6 : index
    %c0_31 = arith.constant 0 : index
    %77 = vector.load %arg3[%c6, %c0_31] : memref<16x128xf32, #tpu.memory_space<vmem>>, vector<1x128xf32>
    %78 = vector.broadcast %77 : vector<1x128xf32> to vector<56x128xf32>
    %79 = arith.addf %76, %78 : vector<56x128xf32>
    %cst_32 = arith.constant dense<0.000000e+00> : vector<56xf32>
    %80 = vector.multi_reduction <add>, %79, %cst_32 [1] : vector<56x128xf32> to vector<56xf32>
    %81 = vector.shape_cast %80 : vector<56xf32> to vector<56x1xf32>
    %cst_33 = arith.constant 1.250000e-01 : f32
    %82 = vector.broadcast %cst_33 : f32 to vector<56x1xf32>
    %83 = arith.mulf %81, %82 : vector<56x1xf32>
    %84 = vector.broadcast %83 : vector<56x1xf32> to vector<56x128xf32>
    %85 = arith.subf %79, %84 : vector<56x128xf32>
    %86 = vector.broadcast %5 : vector<1x128xf32> to vector<56x128xf32>
    %87 = arith.mulf %85, %86 : vector<56x128xf32>
    %88 = arith.mulf %87, %87 : vector<56x128xf32>
    %cst_34 = arith.constant dense<0.000000e+00> : vector<56xf32>
    %89 = vector.multi_reduction <add>, %88, %cst_34 [1] : vector<56x128xf32> to vector<56xf32>
    %90 = vector.shape_cast %89 : vector<56xf32> to vector<56x1xf32>
    %cst_35 = arith.constant 1.250000e-01 : f32
    %91 = vector.broadcast %cst_35 : f32 to vector<56x1xf32>
    %92 = arith.mulf %90, %91 : vector<56x1xf32>
    %93 = vector.broadcast %83 : vector<56x1xf32> to vector<56x128xf32>
    %94 = arith.subf %79, %93 : vector<56x128xf32>
    %cst_36 = arith.constant 9.99999974E-6 : f32
    %95 = vector.broadcast %cst_36 : f32 to vector<56x1xf32>
    %96 = arith.addf %92, %95 : vector<56x1xf32>
    %97 = math.rsqrt %96 : vector<56x1xf32>
    %98 = vector.broadcast %97 : vector<56x1xf32> to vector<56x128xf32>
    %99 = arith.mulf %94, %98 : vector<56x128xf32>
    %c7 = arith.constant 7 : index
    %c0_37 = arith.constant 0 : index
    %100 = vector.load %arg3[%c7, %c0_37] : memref<16x128xf32, #tpu.memory_space<vmem>>, vector<1x128xf32>
    %101 = vector.broadcast %100 : vector<1x128xf32> to vector<56x128xf32>
    %102 = arith.mulf %99, %101 : vector<56x128xf32>
    %c8 = arith.constant 8 : index
    %c0_38 = arith.constant 0 : index
    %103 = vector.load %arg3[%c8, %c0_38] : memref<16x128xf32, #tpu.memory_space<vmem>>, vector<1x128xf32>
    %104 = vector.broadcast %103 : vector<1x128xf32> to vector<56x128xf32>
    %105 = arith.addf %102, %104 : vector<56x128xf32>
    %cst_39 = arith.constant 0.000000e+00 : f32
    %106 = vector.broadcast %cst_39 : f32 to vector<56x128xf32>
    %107 = arith.maximumf %105, %106 : vector<56x128xf32>
    %c3_40 = arith.constant 3 : index
    %c0_41 = arith.constant 0 : index
    %c0_42 = arith.constant 0 : index
    %108 = vector.load %arg2[%c3_40, %c0_41, %c0_42] : memref<4x128x128xf32, #tpu.memory_space<vmem>>, vector<1x128x128xf32>
    %109 = vector.shape_cast %108 : vector<1x128x128xf32> to vector<128x128xf32>
    %cst_43 = arith.constant dense<0.000000e+00> : vector<56x128xf32>
    %110 = tpu.matmul %107, %109, %cst_43 {dimension_numbers = #tpu.dot_dimension_numbers<[1], [0], [0], [1], [0, 0, 1, 1], [], []>} : vector<56x128xf32>, vector<128x128xf32>, vector<56x128xf32> -> vector<56x128xf32>
    %c9 = arith.constant 9 : index
    %c0_44 = arith.constant 0 : index
    %111 = vector.load %arg3[%c9, %c0_44] : memref<16x128xf32, #tpu.memory_space<vmem>>, vector<1x128xf32>
    %112 = vector.broadcast %111 : vector<1x128xf32> to vector<56x128xf32>
    %113 = arith.addf %110, %112 : vector<56x128xf32>
    %c0_45 = arith.constant 0 : index
    %c0_46 = arith.constant 0 : index
    %114 = vector.load %arg4[%c0_45, %c0_46] : memref<56x128xf32, #tpu.memory_space<vmem>>, vector<56x128xf32>
    tpu.vector_store %arg4[%c0_45, %c0_46], %113 {strides = array<i32>} : memref<56x128xf32, #tpu.memory_space<vmem>>, vector<56x128xf32>,
    return
  }
  func.func @transform_0(%arg0: i32) -> (i32, i32) {
    %c0_i32 = arith.constant 0 : i32
    %c0_i32_0 = arith.constant 0 : i32
    return %arg0, %c0_i32 : i32, i32
  }
  func.func @transform_1(%arg0: i32) -> (i32, i32, i32) {
    %c0_i32 = arith.constant 0 : i32
    %c0_i32_0 = arith.constant 0 : i32
    %c0_i32_1 = arith.constant 0 : i32
    %c0_i32_2 = arith.constant 0 : i32
    return %c0_i32, %c0_i32_0, %c0_i32_1 : i32, i32, i32
  }
  func.func @transform_2(%arg0: i32) -> (i32, i32) {
    %c0_i32 = arith.constant 0 : i32
    %c0_i32_0 = arith.constant 0 : i32
    %c0_i32_1 = arith.constant 0 : i32
    return %c0_i32, %c0_i32_0 : i32, i32
  }
  func.func @transform_3(%arg0: i32) -> (i32, i32) {
    %c0_i32 = arith.constant 0 : i32
    %c0_i32_0 = arith.constant 0 : i32
    return %arg0, %c0_i32 : i32, i32
  }
}

</mosaic_0001>

<bundles_post_ra>
// kernel: tpu_custom_call.1
= control target key start
LH: loop header
LB: loop body
LE: loop exit
PB: predicated region body
PF: predicated region fallthrough
CT: control target
= control target key end

     0   :  { %8 = vsyncpa [#allocation3], 0  ;;  %s1773_s0 = inlined_call_operand.hbm [shape: f32[56,128], index: 0, kind: input, shape index: {}]   ;;  %s1774_s1 = inlined_call_operand.hbm [shape: f32[4,128,128], index: 1, kind: input, shape index: {}]   ;;  %s1775_s2 = inlined_call_operand.hbm [shape: f32[16,128], index: 2, kind: input, shape index: {}]   ;;  %s1776_s3 = inlined_call_operand.hbm [shape: f32[56,128], index: 3, kind: output, shape index: {}]  }
   0x1   :  { %9 = vsyncpa [#allocation6], 0 }
   0x2   :  { %10 = vsyncpa [#allocation4], 0  ;;  %s1481_s12 = smov [#allocation5]   ;;  %s1482_s14 = smov [#allocation2]  }
   0x3   :  { %s28_s13 = sshll.u32 %s1481_s12, 4  ;;  %s16_s15 = sshll.u32 %s1482_s14, 4  ;;  %s29_s13 = int_to_ptr.vmem [resolvable:$true] %s28_s13  ;;  %s1510_s15 = int_to_ptr.vmem [resolvable:$true] %s16_s15 }
   0x4   :  { %s1387_s18 = scalar_lea.hbm %s1774_s1, 8192 }
   0x5   :  { %p1388_p0 = scmp.ne.s32.totalorder %s1774_s1, %s1387_s18  ;;  %p1391_p1 = scmp.lt.u32.totalorder %s1387_s18, %s1774_s1 }
   0x7   :  { %p1393_p2 = pnand %p1391_p1, %p1388_p0 }
   0x9   :  { %1396 = shalt.err (!%p1393_p2)
}
   0xa   :  { %s1397_s23 = scalar_lea.vmem %s29_s13, 8192  ;;  %p1402_p4 = scmp.lt.s32.totalorder %s29_s13, %s29_s13 }
   0xb   :  { %p1398_p3 = scmp.ne.s32.totalorder %s29_s13, %s1397_s23  ;;  %p1403_p5 = scmp.lt.s32.totalorder %s1397_s23, %s1397_s23 }
   0xd   :  { %p1404_p6 = por %p1403_p5, %p1402_p4 }
   0xf   :  { %p1405_p7 = pnand %p1404_p6, %p1398_p3 }
  0x11   :  { %1408 = shalt.err (!%p1405_p7)
}
  0x12   :  { %s1483_s24 = smov 128   ;;  %s1484_s25 = smov 8  }
  0x13   :  { %34 = dma.hbm_to_vmem [thread:$0]  %s1774_s1, 8192, %s29_s13, [#allocation6], %s1483_s24, %s1483_s24, %s1484_s25  }
  0x14   :  { %s1409_s30 = scalar_lea.hbm %s1773_s0, 896 }
  0x15   :  { %p1410_p8 = scmp.ne.s32.totalorder %s1773_s0, %s1409_s30  ;;  %p1413_p9 = scmp.lt.u32.totalorder %s1409_s30, %s1773_s0 }
  0x17   :  { %p1415_p10 = pnand %p1413_p9, %p1410_p8 }
  0x19   :  { %1418 = shalt.err (!%p1415_p10)
}
  0x1a   :  { %s1419_s8 = scalar_lea.vmem %s1510_s15, 896  ;;  %p1424_p12 = scmp.lt.s32.totalorder %s1510_s15, %s1510_s15 }
  0x1b   :  { %p1420_p11 = scmp.ne.s32.totalorder %s1510_s15, %s1419_s8  ;;  %p1425_p13 = scmp.lt.s32.totalorder %s1419_s8, %s1419_s8 }
  0x1d   :  { %p1426_p0 = por %p1425_p13, %p1424_p12 }
  0x1f   :  { %p1427_p1 = pnand %p1426_p0, %p1420_p11 }
  0x21   :  { %1430 = shalt.err (!%p1427_p1)
}
  0x22   :  { %22 = dma.hbm_to_vmem [thread:$0]  %s1773_s0, 896, %s1510_s15, [#allocation3], %s1483_s24, %s1483_s24, %s1484_s25  }
  0x23   :  { %s1485_s10 = smov [#allocation7]   ;;  %s1431_s14 = scalar_lea.hbm %s1775_s2, 256 }
  0x24   :  { %s40_s11 = sshll.u32 %s1485_s10, 4  ;;  %p1432_p2 = scmp.ne.s32.totalorder %s1775_s2, %s1431_s14  ;;  %s41_s11 = int_to_ptr.vmem [resolvable:$true] %s40_s11 }
  0x25   :  { %p1435_p3 = scmp.lt.u32.totalorder %s1431_s14, %s1775_s2 }
  0x27   :  { %p1437_p4 = pnand %p1435_p3, %p1432_p2 }
  0x29   :  { %1440 = shalt.err (!%p1437_p4)
}
  0x2a   :  { %s1441_s20 = scalar_lea.vmem %s41_s11, 256  ;;  %p1446_p6 = scmp.lt.s32.totalorder %s41_s11, %s41_s11 }
  0x2b   :  { %p1442_p5 = scmp.ne.s32.totalorder %s41_s11, %s1441_s20  ;;  %p1447_p7 = scmp.lt.s32.totalorder %s1441_s20, %s1441_s20 }
  0x2d   :  { %p1448_p8 = por %p1447_p7, %p1446_p6 }
  0x2f   :  { %p1449_p9 = pnand %p1448_p8, %p1442_p5 }
  0x31   :  { %1452 = shalt.err (!%p1449_p9)
}
  0x32   :  { %46 = dma.hbm_to_vmem [thread:$0]  %s1775_s2, 256, %s41_s11, [#allocation6], %s1483_s24, %s1483_s24, %s1484_s25  }
  0x33   :  { %1475 = dma.done.wait [#allocation3], 896  }
  0x34   :  { %1476 = vsyncadd [#allocation3], 4294966400 }
  0x35   :  { %1477 = dma.done.wait [#allocation6], 8448  }
  0x36   :  { %1478 = vsyncadd [#allocation6], 4294958848  ;;  %v1486_v0 = vmov 0.0|0.0   ;;  %vm1487_vm0 = vmmov 0   ;;  %v1488_v1 = vmov 0.0   ;;  %v68_v2 = vld [vmem:[#allocation5] sm:$0xff]  ;;  %v63_v61 = vlaneseq }
  0x37   :  { %1240 = vmatprep.subr.bf16.mxu0 %v1486_v0  ;;  %1060 = vmatprep.mubr.msk.f32.mxu0 %vm1487_vm0, %v1488_v1  ;;  %v69_v3 = vld [vmem:[#allocation5 + $0x8] sm:$0xff]  ;;  %v70_v4 = vld [vmem:[#allocation5 + $0x10] sm:$0xff]  ;;  %v71_v6 = vld [vmem:[#allocation5 + $0x18] sm:$0xff]  ;;  %s1489_s2 = smov [#allocation8]  }
  0x38   :  { %1264 = vmatprep.subr.bf16.mxu1 %v1486_v0  ;;  %1113 = vmatprep.mubr.msk.f32.mxu1 %vm1487_vm0, %v1488_v1  ;;  %v1241_v5 = vpack.c.bf16 %v69_v3, %v68_v2  ;;  %v1244_v7 = vpack.c.bf16 %v71_v6, %v70_v4  ;;  %v72_v8 = vld [vmem:[#allocation5 + $0x20] sm:$0xff]  ;;  %v73_v9 = vld [vmem:[#allocation5 + $0x28] sm:$0xff]  ;;  %v74_v11 = vld [vmem:[#allocation5 + $0x30] sm:$0xff]  ;;  %v64_v62 = vand.u32 127, %v63_v61  ;;  %s912_s21 = sshll.u32 %s1489_s2, 4  ;;  %s913_s21 = int_to_ptr.vmem [resolvable:$true] %s912_s21 }
  0x39   :  { %v1247_v10 = vpack.c.bf16 %v73_v9, %v72_v8  ;;  %v75_v12 = vld [vmem:[#allocation5 + $0x38] sm:$0xff]  ;;  %v76_v14 = vld [vmem:[#allocation5 + $0x40] sm:$0xff]  ;;  %v77_v15 = vld [vmem:[#allocation5 + $0x48] sm:$0xff]  ;;  %s1453_s22 = scalar_lea.vmem %s913_s21, 896  ;;  %p1458_p11 = scmp.lt.s32.totalorder %s913_s21, %s913_s21 }
  0x3a   :  { %1242 = vmatpush3.bf16.msra.mxu0 %v1241_v5  ;;  %v1250_v13 = vpack.c.bf16 %v75_v12, %v74_v11  ;;  %v1253_v16 = vpack.c.bf16 %v77_v15, %v76_v14  ;;  %v78_v17 = vld [vmem:[#allocation5 + $0x50] sm:$0xff]  ;;  %v79_v18 = vld [vmem:[#allocation5 + $0x58] sm:$0xff]  ;;  %v80_v20 = vld [vmem:[#allocation5 + $0x60] sm:$0xff]  ;;  %vm65_vm1 = vcmp.lt.s32.totalorder %v64_v62, 8  ;;  %p1454_p10 = scmp.ne.s32.totalorder %s913_s21, %s1453_s22  ;;  %p1459_p12 = scmp.lt.s32.totalorder %s1453_s22, %s1453_s22 }
  0x3b   :  { %1243 = vmatprep.subr.bf16.mxu0 %v1486_v0  ;;  %v1256_v19 = vpack.c.bf16 %v79_v18, %v78_v17  ;;  %v81_v21 = vld [vmem:[#allocation5 + $0x68] sm:$0xff]  ;;  %v82_v23 = vld [vmem:[#allocation5 + $0x70] sm:$0xff]  ;;  %v83_v24 = vld [vmem:[#allocation5 + $0x78] sm:$0xff]  ;;  %v1593_v3 = vsel %vm65_vm1, 1.0, %v1488_v1 }
  0x3c   :  { %v1259_v22 = vpack.c.bf16 %v81_v21, %v80_v20  ;;  %v1262_v25 = vpack.c.bf16 %v83_v24, %v82_v23  ;;  %v56_v26 = vld [vmem:[#allocation2] sm:$0xff]  ;;  %v57_v27 = vld [vmem:[#allocation2 + $0x8] sm:$0xff]  ;;  %v58_v28 = vld [vmem:[#allocation2 + $0x10] sm:$0xff]  ;;  %p1460_p13 = por %p1459_p12, %p1458_p11 }
  0x3d   :  { %v59_v29 = vld [vmem:[#allocation2 + $0x18] sm:$0xff]  ;;  %v60_v30 = vld [vmem:[#allocation2 + $0x20] sm:$0xff]  ;;  %v61_v31 = vld [vmem:[#allocation2 + $0x28] sm:$0xff] }
  0x3e   :  { %1245 = vmatpush3.bf16.msra.mxu0 %v1244_v7  ;;  %v62_v32 = vld [vmem:[#allocation2 + $0x30] sm:$0xff]  ;;  %v926_v33 = vld [vmem:[#allocation7] ss:$0 sm:$0xff]  ;;  %v306_v56 = vld [vmem:[#allocation5 + $0x88] sm:$0xff]  ;;  %p1461_p0 = pnand %p1460_p13, %p1454_p10 }
  0x3f   :  { %1246 = vmatprep.subr.bf16.mxu0 %v1486_v0  ;;  %v305_v55 = vld [vmem:[#allocation5 + $0x80] sm:$0xff]  ;;  %v307_v57 = vld [vmem:[#allocation5 + $0x90] sm:$0xff]  ;;  %v308_v59 = vld [vmem:[#allocation5 + $0x98] sm:$0xff] }
  0x40   :  { %v1265_v58 = vpack.c.bf16 %v306_v56, %v305_v55  ;;  %v1268_v60 = vpack.c.bf16 %v308_v59, %v307_v57 }
  0x42   :  { %1248 = vmatpush3.bf16.msra.mxu0 %v1247_v10  ;;  %1266 = vmatpush3.bf16.msra.mxu1 %v1265_v58 }
  0x43   :  { %1249 = vmatprep.subr.bf16.mxu0 %v1486_v0  ;;  %1267 = vmatprep.subr.bf16.mxu1 %v1486_v0 }
  0x46   :  { %1251 = vmatpush3.bf16.msra.mxu0 %v1250_v13  ;;  %1269 = vmatpush3.bf16.msra.mxu1 %v1268_v60 }
  0x47   :  { %1252 = vmatprep.subr.bf16.mxu0 %v1486_v0  ;;  %1270 = vmatprep.subr.bf16.mxu1 %v1486_v0 }
  0x4a   :  { %1254 = vmatpush3.bf16.msra.mxu0 %v1253_v16 }
  0x4b   :  { %1255 = vmatprep.subr.bf16.mxu0 %v1486_v0 }
  0x4e   :  { %1257 = vmatpush3.bf16.msra.mxu0 %v1256_v19 }
  0x4f   :  { %1258 = vmatprep.subr.bf16.mxu0 %v1486_v0 }
  0x52   :  { %1260 = vmatpush3.bf16.msra.mxu0 %v1259_v22 }
  0x53   :  { %1261 = vmatprep.subr.bf16.mxu0 %v1486_v0 }
  0x56   :  { %1263 = vmatpush3.bf16.msra.mxu0 %v1262_v25 }
  0x57   :  { %1288 = vmatprep.subr.bf16.mxu0 %v1486_v0 }
  0x59   :  { %1061 = vmatmul.mubr.f32.vlgmr.msra.gmra.mrb[0].mxu0 %v56_v26  ;;  %v309_v26 = vld [vmem:[#allocation5 + $0xa0] sm:$0xff] }
  0x5a   :  { %1063 = vmatprep.mubr.msk.f32.mxu0 %vm1487_vm0, %v1488_v1 }
  0x5d   :  { %1064 = vmatmul.mubr.f32.gmra.mrb[2].mxu0 %v57_v27  ;;  %v310_v27 = vld [vmem:[#allocation5 + $0xa8] sm:$0xff] }
  0x5e   :  { %1066 = vmatprep.mubr.msk.f32.mxu0 %vm1487_vm0, %v1488_v1 }
  0x61   :  { %1067 = vmatmul.mubr.f32.gmra.mrb[4].mxu0 %v58_v28 }
  0x62   :  { %1069 = vmatprep.mubr.msk.f32.mxu0 %vm1487_vm0, %v1488_v1 }
  0x65   :  { %1070 = vmatmul.mubr.f32.gmra.mrb[6].mxu0 %v59_v29 }
  0x66   :  { %1072 = vmatprep.mubr.msk.f32.mxu0 %vm1487_vm0, %v1488_v1 }
  0x69   :  { %1073 = vmatmul.mubr.f32.gmra.mrb[8].mxu0 %v60_v30  ;;  %v1271_v30 = vpack.c.bf16 %v310_v27, %v309_v26 }
  0x6a   :  { %1075 = vmatprep.mubr.msk.f32.mxu0 %vm1487_vm0, %v1488_v1 }
  0x6b   :  { %1272 = vmatpush3.bf16.msra.mxu1 %v1271_v30 }
  0x6c   :  { %1273 = vmatprep.subr.bf16.mxu1 %v1486_v0 }
  0x6d   :  { %1076 = vmatmul.mubr.f32.gmra.mrb[10].mxu0 %v61_v31 }
  0x6e   :  { %1078 = vmatprep.mubr.msk.f32.mxu0 %vm1487_vm0, %v1488_v1 }
  0x71   :  { %1079 = vmatmul.mubr.f32.gmra.mrb[12].mxu0 %v62_v32 }
  0x72   :  { %1166 = vmatprep.mubr.msk.f32.mxu0 %vm1487_vm0, %v1488_v1 }
 0x12c   :  { %v155_v34 = vpop.f32.mrb[0].mxu0 }
 0x12d   :  { %v156_v35 = vadd.f32 %v926_v33, %v155_v34  ;;  %v1062_v36 = vpop.f32.mrb[1].mxu0  ;;  %v311_v34 = vld [vmem:[#allocation5 + $0xb0] sm:$0xff] }
 0x12f   :  { %189 = vadd.xlane.f32.xlu0 %v156_v35 }
 0x130   :  { %v160_v37 = vpop.f32.mrb[2].mxu0 }
 0x131   :  { %v161_v38 = vadd.f32 %v926_v33, %v160_v37  ;;  %v1065_v39 = vpop.f32.mrb[3].mxu0 }
 0x133   :  { %191 = vadd.xlane.f32.xlu0 %v161_v38 }
 0x134   :  { %v165_v40 = vpop.f32.mrb[4].mxu0 }
 0x135   :  { %v166_v41 = vadd.f32 %v926_v33, %v165_v40  ;;  %v1068_v42 = vpop.f32.mrb[5].mxu0 }
 0x136   :  { %v314_v42 = vld [vmem:[#allocation5 + $0xc8] sm:$0xff] }
 0x137   :  { %193 = vadd.xlane.f32.xlu1 %v166_v41 }
 0x138   :  { %v170_v43 = vpop.f32.mrb[6].mxu0 }
 0x139   :  { %v171_v44 = vadd.f32 %v926_v33, %v170_v43  ;;  %v1071_v45 = vpop.f32.mrb[7].mxu0 }
 0x13b   :  { %195 = vadd.xlane.f32.xlu1 %v171_v44 }
 0x13c   :  { %v175_v46 = vpop.f32.mrb[8].mxu0 }
 0x13d   :  { %v176_v47 = vadd.f32 %v926_v33, %v175_v46  ;;  %v1074_v48 = vpop.f32.mrb[9].mxu0  ;;  %v315_v46 = vld [vmem:[#allocation5 + $0xd0] sm:$0xff] }
 0x13f   :  { %197 = vadd.xlane.f32.xlu0 %v176_v47 }
 0x140   :  { %v180_v49 = vpop.f32.mrb[10].mxu0 }
 0x141   :  { %v181_v50 = vadd.f32 %v926_v33, %v180_v49  ;;  %v1077_v51 = vpop.f32.mrb[11].mxu0  ;;  %v317_v49 = vld [vmem:[#allocation5 + $0xe0] sm:$0xff] }
 0x143   :  { %199 = vadd.xlane.f32.xlu1 %v181_v50 }
 0x144   :  { %v185_v52 = vpop.f32.mrb[12].mxu0 }
 0x145   :  { %v186_v53 = vadd.f32 %v926_v33, %v185_v52  ;;  %v1080_v54 = vpop.f32.mrb[13].mxu0  ;;  %v319_v52 = vld [vmem:[#allocation5 + $0xf0] sm:$0xff] }
 0x147   :  { %201 = vadd.xlane.f32.xlu0 %v186_v53 }
 0x1bc   :  { %v190_v63 = vpop.xlane.xlu0 %189 }
 0x1bd   :  { %v203_v2 = vmul.f32 0.125, %v190_v63 }
 0x1bf   :  { %v1595_v4 = vsub.f32 %v156_v35, %v203_v2  ;;  %v312_v35 = vld [vmem:[#allocation5 + $0xb8] sm:$0xff] }
 0x1c0   :  { %v192_v5 = vpop.xlane.xlu0 %191 }
 0x1c1   :  { %v204_v6 = vmul.f32 0.125, %v192_v5  ;;  %v217_v7 = vmul.f32 %v1593_v3, %v1595_v4 }
 0x1c3   :  { %v1599_v8 = vsub.f32 %v161_v38, %v204_v6  ;;  %v224_v9 = vmul.f32 %v217_v7, %v217_v7  ;;  %v1274_v38 = vpack.c.bf16 %v312_v35, %v311_v34 }
 0x1c4   :  { %v194_v10 = vpop.xlane.xlu1 %193 }
 0x1c5   :  { %v205_v11 = vmul.f32 0.125, %v194_v10  ;;  %231 = vadd.xlane.f32.xlu1 %v224_v9  ;;  %v218_v12 = vmul.f32 %v1593_v3, %v1599_v8  ;;  %1275 = vmatpush3.bf16.msra.mxu1 %v1274_v38  ;;  %v927_v9 = vld [vmem:[#allocation7 + $0x1] ss:$0 sm:$0xff] }
 0x1c6   :  { %1276 = vmatprep.subr.bf16.mxu1 %v1486_v0 }
 0x1c7   :  { %v1603_v13 = vsub.f32 %v166_v41, %v205_v11  ;;  %v225_v14 = vmul.f32 %v218_v12, %v218_v12  ;;  %v313_v41 = vld [vmem:[#allocation5 + $0xc0] sm:$0xff] }
 0x1c8   :  { %v196_v15 = vpop.xlane.xlu1 %195 }
 0x1c9   :  { %v206_v16 = vmul.f32 0.125, %v196_v15  ;;  %233 = vadd.xlane.f32.xlu0 %v225_v14  ;;  %v219_v17 = vmul.f32 %v1593_v3, %v1603_v13  ;;  %v928_v14 = vld [vmem:[#allocation7 + $0x2] ss:$0 sm:$0xff] }
 0x1cb   :  { %v1607_v18 = vsub.f32 %v171_v44, %v206_v16  ;;  %v226_v19 = vmul.f32 %v219_v17, %v219_v17  ;;  %v1277_v44 = vpack.c.bf16 %v314_v42, %v313_v41 }
 0x1cc   :  { %v198_v20 = vpop.xlane.xlu0 %197 }
 0x1cd   :  { %v207_v21 = vmul.f32 0.125, %v198_v20  ;;  %235 = vadd.xlane.f32.xlu1 %v226_v19  ;;  %v220_v22 = vmul.f32 %v1593_v3, %v1607_v18  ;;  %1278 = vmatpush3.bf16.msra.mxu1 %v1277_v44 }
 0x1ce   :  { %1279 = vmatprep.subr.bf16.mxu1 %v1486_v0 }
 0x1cf   :  { %v1611_v23 = vsub.f32 %v176_v47, %v207_v21  ;;  %v227_v24 = vmul.f32 %v220_v22, %v220_v22  ;;  %v316_v47 = vld [vmem:[#allocation5 + $0xd8] sm:$0xff] }
 0x1d0   :  { %v200_v25 = vpop.xlane.xlu1 %199  ;;  %v1280_v48 = vpack.c.bf16 %v316_v47, %v315_v46 }
 0x1d1   :  { %v208_v28 = vmul.f32 0.125, %v200_v25  ;;  %237 = vadd.xlane.f32.xlu0 %v227_v24  ;;  %v221_v29 = vmul.f32 %v1593_v3, %v1611_v23 }
 0x1d2   :  { %1281 = vmatpush3.bf16.msra.mxu1 %v1280_v48 }
 0x1d3   :  { %v1615_v31 = vsub.f32 %v181_v50, %v208_v28  ;;  %v228_v32 = vmul.f32 %v221_v29, %v221_v29  ;;  %1282 = vmatprep.subr.bf16.mxu1 %v1486_v0  ;;  %v318_v50 = vld [vmem:[#allocation5 + $0xe8] sm:$0xff] }
 0x1d4   :  { %v202_v33 = vpop.xlane.xlu0 %201  ;;  %v1283_v51 = vpack.c.bf16 %v318_v50, %v317_v49 }
 0x1d5   :  { %v209_v36 = vmul.f32 0.125, %v202_v33  ;;  %239 = vadd.xlane.f32.xlu1 %v228_v32  ;;  %v222_v37 = vmul.f32 %v1593_v3, %v1615_v31 }
 0x1d6   :  { %1284 = vmatpush3.bf16.msra.mxu1 %v1283_v51 }
 0x1d7   :  { %v1620_v39 = vsub.f32 %v186_v53, %v209_v36  ;;  %v229_v40 = vmul.f32 %v222_v37, %v222_v37  ;;  %1285 = vmatprep.subr.bf16.mxu1 %v1486_v0  ;;  %v320_v53 = vld [vmem:[#allocation5 + $0xf8] sm:$0xff] }
 0x1d8   :  { %v1286_v54 = vpack.c.bf16 %v320_v53, %v319_v52  ;;  %v929_v53 = vld [vmem:[#allocation7 + $0x3] ss:$0 sm:$0xff] }
 0x1d9   :  { %241 = vadd.xlane.f32.xlu0 %v229_v40  ;;  %v223_v43 = vmul.f32 %v1593_v3, %v1620_v39 }
 0x1da   :  { %1287 = vmatpush3.bf16.msra.mxu1 %v1286_v54 }
 0x1db   :  { %v230_v45 = vmul.f32 %v223_v43, %v223_v43  ;;  %1312 = vmatprep.subr.bf16.mxu1 %v1486_v0 }
 0x1dd   :  { %243 = vadd.xlane.f32.xlu1 %v230_v45 }
 0x252   :  { %v232_v55 = vpop.xlane.xlu1 %231 }
 0x253   :  { %v245_v56 = vmul.f32 0.125, %v232_v55 }
 0x255   :  { %v252_v57 = vadd.f32 1e-05, %v245_v56 }
 0x256   :  { %v234_v58 = vpop.xlane.xlu0 %233 }
 0x257   :  { %1345 = vrsqrt.f32 %v252_v57  ;;  %v246_v59 = vmul.f32 0.125, %v234_v58 }
 0x259   :  { %v253_v60 = vadd.f32 1e-05, %v246_v59 }
 0x25a   :  { %v236_v61 = vpop.xlane.xlu1 %235 }
 0x25b   :  { %1347 = vrsqrt.f32 %v253_v60  ;;  %v247_v62 = vmul.f32 0.125, %v236_v61 }
 0x25d   :  { %v254_v63 = vadd.f32 1e-05, %v247_v62 }
 0x25e   :  { %v238_v2 = vpop.xlane.xlu0 %237 }
 0x25f   :  { %1349 = vrsqrt.f32 %v254_v63  ;;  %v248_v5 = vmul.f32 0.125, %v238_v2 }
 0x261   :  { %v1346_v6 = vpop.eup %1345  ;;  %v255_v7 = vadd.f32 1e-05, %v248_v5 }
 0x262   :  { %v240_v10 = vpop.xlane.xlu1 %239  ;;  %v266_v11 = vmul.f32 %v1346_v6, %v1595_v4 }
 0x263   :  { %1351 = vrsqrt.f32 %v255_v7  ;;  %v249_v12 = vmul.f32 0.125, %v240_v10 }
 0x264   :  { %v278_v15 = vmul.f32 %v927_v9, %v266_v11 }
 0x265   :  { %v1348_v16 = vpop.eup %1347  ;;  %v256_v17 = vadd.f32 1e-05, %v249_v12 }
 0x266   :  { %v242_v19 = vpop.xlane.xlu0 %241  ;;  %v290_v20 = vadd.f32 %v928_v14, %v278_v15  ;;  %v267_v21 = vmul.f32 %v1348_v16, %v1599_v8  ;;  %v542_v16 = vld [vmem:[#allocation5 + $0x100] sm:$0xff] }
 0x267   :  { %1353 = vrsqrt.f32 %v256_v17  ;;  %v250_v22 = vmul.f32 0.125, %v242_v19  ;;  %v543_v17 = vld [vmem:[#allocation5 + $0x108] sm:$0xff]  ;;  %v544_v19 = vld [vmem:[#allocation5 + $0x110] sm:$0xff] }
 0x268   :  { %v297_v24 = vmax.f32 %v290_v20, 0.0  ;;  %v279_v25 = vmul.f32 %v927_v9, %v267_v21  ;;  %v1289_v20 = vpack.c.bf16 %v543_v17, %v542_v16  ;;  %v545_v21 = vld [vmem:[#allocation5 + $0x118] sm:$0xff] }
 0x269   :  { %v1350_v26 = vpop.eup %1349  ;;  %v257_v27 = vadd.f32 1e-05, %v250_v22  ;;  %v1292_v22 = vpack.c.bf16 %v545_v21, %v544_v19 }
 0x26a   :  { %1114 = vmatmul.mubr.f32.vlgmr.msra.gmra.mrb[0].mxu1 %v297_v24  ;;  %v244_v28 = vpop.xlane.xlu1 %243  ;;  %v291_v29 = vadd.f32 %v928_v14, %v279_v25  ;;  %v268_v4 = vmul.f32 %v1350_v26, %v1603_v13  ;;  %1290 = vmatpush3.bf16.msra.mxu0 %v1289_v20 }
 0x26b   :  { %1355 = vrsqrt.f32 %v257_v27  ;;  %v251_v30 = vmul.f32 0.125, %v244_v28  ;;  %1116 = vmatprep.mubr.msk.f32.mxu1 %vm1487_vm0, %v1488_v1  ;;  %1291 = vmatprep.subr.bf16.mxu0 %v1486_v0 }
 0x26c   :  { %v298_v32 = vmax.f32 %v291_v29, 0.0  ;;  %v280_v33 = vmul.f32 %v927_v9, %v268_v4 }
 0x26d   :  { %v1352_v34 = vpop.eup %1351  ;;  %v258_v8 = vadd.f32 1e-05, %v251_v30 }
 0x26e   :  { %1117 = vmatmul.mubr.f32.gmra.mrb[2].mxu1 %v298_v32  ;;  %v292_v35 = vadd.f32 %v928_v14, %v280_v33  ;;  %v269_v36 = vmul.f32 %v1352_v34, %v1607_v18  ;;  %1293 = vmatpush3.bf16.msra.mxu0 %v1292_v22 }
 0x26f   :  { %1357 = vrsqrt.f32 %v258_v8  ;;  %1119 = vmatprep.mubr.msk.f32.mxu1 %vm1487_vm0, %v1488_v1  ;;  %1294 = vmatprep.subr.bf16.mxu0 %v1486_v0 }
 0x270   :  { %v299_v37 = vmax.f32 %v292_v35, 0.0  ;;  %v281_v38 = vmul.f32 %v927_v9, %v269_v36 }
 0x271   :  { %v1354_v13 = vpop.eup %1353 }
 0x272   :  { %1120 = vmatmul.mubr.f32.gmra.mrb[4].mxu1 %v299_v37  ;;  %v293_v40 = vadd.f32 %v928_v14, %v281_v38  ;;  %v270_v41 = vmul.f32 %v1354_v13, %v1611_v23 }
 0x273   :  { %1122 = vmatprep.mubr.msk.f32.mxu1 %vm1487_vm0, %v1488_v1 }
 0x274   :  { %v300_v42 = vmax.f32 %v293_v40, 0.0  ;;  %v282_v43 = vmul.f32 %v927_v9, %v270_v41 }
 0x275   :  { %v1356_v44 = vpop.eup %1355 }
 0x276   :  { %1123 = vmatmul.mubr.f32.gmra.mrb[6].mxu1 %v300_v42  ;;  %v294_v45 = vadd.f32 %v928_v14, %v282_v43  ;;  %v271_v18 = vmul.f32 %v1356_v44, %v1615_v31 }
 0x277   :  { %1125 = vmatprep.mubr.msk.f32.mxu1 %vm1487_vm0, %v1488_v1 }
 0x278   :  { %v301_v46 = vmax.f32 %v294_v45, 0.0  ;;  %v283_v47 = vmul.f32 %v927_v9, %v271_v18 }
 0x279   :  { %v1358_v48 = vpop.eup %1357 }
 0x27a   :  { %1126 = vmatmul.mubr.f32.gmra.mrb[8].mxu1 %v301_v46  ;;  %v295_v49 = vadd.f32 %v928_v14, %v283_v47  ;;  %v272_v23 = vmul.f32 %v1358_v48, %v1620_v39  ;;  %v546_v46 = vld [vmem:[#allocation5 + $0x120] sm:$0xff]  ;;  %v547_v47 = vld [vmem:[#allocation5 + $0x128] sm:$0xff] }
 0x27b   :  { %1128 = vmatprep.mubr.msk.f32.mxu1 %vm1487_vm0, %v1488_v1 }
 0x27c   :  { %v302_v50 = vmax.f32 %v295_v49, 0.0  ;;  %v284_v51 = vmul.f32 %v927_v9, %v272_v23  ;;  %v1295_v23 = vpack.c.bf16 %v547_v47, %v546_v46 }
 0x27e   :  { %1129 = vmatmul.mubr.f32.gmra.mrb[10].mxu1 %v302_v50  ;;  %v296_v52 = vadd.f32 %v928_v14, %v284_v51  ;;  %1296 = vmatpush3.bf16.msra.mxu0 %v1295_v23 }
 0x27f   :  { %1131 = vmatprep.mubr.msk.f32.mxu1 %vm1487_vm0, %v1488_v1  ;;  %1297 = vmatprep.subr.bf16.mxu0 %v1486_v0 }
 0x280   :  { %v303_v31 = vmax.f32 %v296_v52, 0.0 }
 0x282   :  { %1132 = vmatmul.mubr.f32.gmra.mrb[12].mxu1 %v303_v31  ;;  %v548_v31 = vld [vmem:[#allocation5 + $0x130] sm:$0xff] }
 0x283   :  { %1219 = vmatprep.mubr.msk.f32.mxu1 %vm1487_vm0, %v1488_v1 }
 0x33d   :  { %v392_v54 = vpop.f32.mrb[0].mxu1 }
 0x33e   :  { %v393_v55 = vadd.f32 %v929_v53, %v392_v54  ;;  %v1115_v56 = vpop.f32.mrb[1].mxu1 }
 0x340   :  { %426 = vadd.xlane.f32.xlu0 %v393_v55 }
 0x341   :  { %v397_v39 = vpop.f32.mrb[2].mxu1 }
 0x342   :  { %v398_v57 = vadd.f32 %v929_v53, %v397_v39  ;;  %v1118_v58 = vpop.f32.mrb[3].mxu1 }
 0x343   :  { %v550_v58 = vld [vmem:[#allocation5 + $0x140] sm:$0xff] }
 0x344   :  { %428 = vadd.xlane.f32.xlu1 %v398_v57 }
 0x345   :  { %v402_v59 = vpop.f32.mrb[4].mxu1 }
 0x346   :  { %v403_v60 = vadd.f32 %v929_v53, %v402_v59  ;;  %v1121_v61 = vpop.f32.mrb[5].mxu1  ;;  %v551_v59 = vld [vmem:[#allocation5 + $0x148] sm:$0xff] }
 0x347   :  { %v1301_v61 = vpack.c.bf16 %v551_v59, %v550_v58 }
 0x348   :  { %430 = vadd.xlane.f32.xlu0 %v403_v60 }
 0x349   :  { %v407_v62 = vpop.f32.mrb[6].mxu1 }
 0x34a   :  { %v408_v63 = vadd.f32 %v929_v53, %v407_v62  ;;  %v1124_v2 = vpop.f32.mrb[7].mxu1 }
 0x34b   :  { %v553_v2 = vld [vmem:[#allocation5 + $0x158] sm:$0xff] }
 0x34c   :  { %432 = vadd.xlane.f32.xlu1 %v408_v63 }
 0x34d   :  { %v412_v5 = vpop.f32.mrb[8].mxu1 }
 0x34e   :  { %v413_v6 = vadd.f32 %v929_v53, %v412_v5  ;;  %v1127_v7 = vpop.f32.mrb[9].mxu1 }
 0x34f   :  { %v555_v7 = vld [vmem:[#allocation5 + $0x168] sm:$0xff] }
 0x350   :  { %434 = vadd.xlane.f32.xlu0 %v413_v6 }
 0x351   :  { %v417_v9 = vpop.f32.mrb[10].mxu1 }
 0x352   :  { %v418_v10 = vadd.f32 %v929_v53, %v417_v9  ;;  %v1130_v11 = vpop.f32.mrb[11].mxu1 }
 0x353   :  { %v557_v11 = vld [vmem:[#allocation5 + $0x178] sm:$0xff] }
 0x354   :  { %436 = vadd.xlane.f32.xlu1 %v418_v10 }
 0x355   :  { %v422_v12 = vpop.f32.mrb[12].mxu1 }
 0x356   :  { %v423_v14 = vadd.f32 %v929_v53, %v422_v12  ;;  %v1133_v15 = vpop.f32.mrb[13].mxu1  ;;  %v549_v53 = vld [vmem:[#allocation5 + $0x138] sm:$0xff] }
 0x357   :  { %v1298_v56 = vpack.c.bf16 %v549_v53, %v548_v31 }
 0x358   :  { %438 = vadd.xlane.f32.xlu0 %v423_v14 }
 0x359   :  { %1299 = vmatpush3.bf16.msra.mxu0 %v1298_v56 }
 0x35a   :  { %1300 = vmatprep.subr.bf16.mxu0 %v1486_v0 }
 0x35d   :  { %1302 = vmatpush3.bf16.msra.mxu0 %v1301_v61 }
 0x35e   :  { %1303 = vmatprep.subr.bf16.mxu0 %v1486_v0 }
 0x3cd   :  { %v427_v24 = vpop.xlane.xlu0 %426 }
 0x3ce   :  { %v440_v25 = vmul.f32 0.125, %v427_v24 }
 0x3d0   :  { %v1652_v26 = vsub.f32 %v393_v55, %v440_v25 }
 0x3d1   :  { %v429_v27 = vpop.xlane.xlu1 %428 }
 0x3d2   :  { %v441_v28 = vmul.f32 0.125, %v429_v27  ;;  %v454_v29 = vmul.f32 %v1593_v3, %v1652_v26 }
 0x3d4   :  { %v1656_v4 = vsub.f32 %v398_v57, %v441_v28  ;;  %v461_v30 = vmul.f32 %v454_v29, %v454_v29 }
 0x3d5   :  { %v431_v32 = vpop.xlane.xlu0 %430 }
 0x3d6   :  { %v442_v33 = vmul.f32 0.125, %v431_v32  ;;  %468 = vadd.xlane.f32.xlu1 %v461_v30  ;;  %v455_v34 = vmul.f32 %v1593_v3, %v1656_v4  ;;  %v930_v30 = vld [vmem:[#allocation7 + $0x4] ss:$0 sm:$0xff] }
 0x3d8   :  { %v1660_v8 = vsub.f32 %v403_v60, %v442_v33  ;;  %v462_v35 = vmul.f32 %v455_v34, %v455_v34 }
 0x3d9   :  { %v433_v36 = vpop.xlane.xlu1 %432 }
 0x3da   :  { %v443_v37 = vmul.f32 0.125, %v433_v36  ;;  %470 = vadd.xlane.f32.xlu0 %v462_v35  ;;  %v456_v38 = vmul.f32 %v1593_v3, %v1660_v8  ;;  %v931_v35 = vld [vmem:[#allocation7 + $0x5] ss:$0 sm:$0xff] }
 0x3dc   :  { %v1664_v13 = vsub.f32 %v408_v63, %v443_v37  ;;  %v463_v40 = vmul.f32 %v456_v38, %v456_v38  ;;  %v552_v63 = vld [vmem:[#allocation5 + $0x150] sm:$0xff] }
 0x3dd   :  { %v435_v41 = vpop.xlane.xlu0 %434  ;;  %v1304_v5 = vpack.c.bf16 %v553_v2, %v552_v63 }
 0x3de   :  { %v444_v42 = vmul.f32 0.125, %v435_v41  ;;  %472 = vadd.xlane.f32.xlu1 %v463_v40  ;;  %v457_v43 = vmul.f32 %v1593_v3, %v1664_v13 }
 0x3df   :  { %1305 = vmatpush3.bf16.msra.mxu0 %v1304_v5 }
 0x3e0   :  { %v1668_v44 = vsub.f32 %v413_v6, %v444_v42  ;;  %v464_v45 = vmul.f32 %v457_v43, %v457_v43  ;;  %1306 = vmatprep.subr.bf16.mxu0 %v1486_v0  ;;  %v554_v6 = vld [vmem:[#allocation5 + $0x160] sm:$0xff] }
 0x3e1   :  { %v437_v18 = vpop.xlane.xlu1 %436  ;;  %v1307_v9 = vpack.c.bf16 %v555_v7, %v554_v6 }
 0x3e2   :  { %v445_v48 = vmul.f32 0.125, %v437_v18  ;;  %474 = vadd.xlane.f32.xlu0 %v464_v45  ;;  %v458_v49 = vmul.f32 %v1593_v3, %v1668_v44 }
 0x3e3   :  { %1308 = vmatpush3.bf16.msra.mxu0 %v1307_v9 }
 0x3e4   :  { %v1672_v50 = vsub.f32 %v418_v10, %v445_v48  ;;  %v465_v51 = vmul.f32 %v458_v49, %v458_v49  ;;  %1309 = vmatprep.subr.bf16.mxu0 %v1486_v0  ;;  %v556_v10 = vld [vmem:[#allocation5 + $0x170] sm:$0xff] }
 0x3e5   :  { %v439_v52 = vpop.xlane.xlu0 %438  ;;  %v1310_v12 = vpack.c.bf16 %v557_v11, %v556_v10  ;;  %v932_v11 = vld [vmem:[#allocation7 + $0x6] ss:$0 sm:$0xff] }
 0x3e6   :  { %v446_v54 = vmul.f32 0.125, %v439_v52  ;;  %476 = vadd.xlane.f32.xlu1 %v465_v51  ;;  %v459_v55 = vmul.f32 %v1593_v3, %v1672_v50 }
 0x3e7   :  { %1311 = vmatpush3.bf16.msra.mxu0 %v1310_v12 }
 0x3e8   :  { %v1677_v39 = vsub.f32 %v423_v14, %v446_v54  ;;  %v466_v57 = vmul.f32 %v459_v55, %v459_v55 }
 0x3ea   :  { %478 = vadd.xlane.f32.xlu0 %v466_v57  ;;  %v460_v60 = vmul.f32 %v1593_v3, %v1677_v39 }
 0x3ec   :  { %v467_v62 = vmul.f32 %v460_v60, %v460_v60 }
 0x3ee   :  { %480 = vadd.xlane.f32.xlu1 %v467_v62 }
 0x463   :  { %v469_v14 = vpop.xlane.xlu1 %468 }
 0x464   :  { %v482_v15 = vmul.f32 0.125, %v469_v14 }
 0x466   :  { %v489_v16 = vadd.f32 1e-05, %v482_v15 }
 0x467   :  { %v471_v17 = vpop.xlane.xlu0 %470 }
 0x468   :  { %1359 = vrsqrt.f32 %v489_v16  ;;  %v483_v19 = vmul.f32 0.125, %v471_v17 }
 0x46a   :  { %v490_v20 = vadd.f32 1e-05, %v483_v19 }
 0x46b   :  { %v473_v21 = vpop.xlane.xlu1 %472 }
 0x46c   :  { %1361 = vrsqrt.f32 %v490_v20  ;;  %v484_v22 = vmul.f32 0.125, %v473_v21 }
 0x46e   :  { %v491_v24 = vadd.f32 1e-05, %v484_v22 }
 0x46f   :  { %v475_v25 = vpop.xlane.xlu0 %474 }
 0x470   :  { %1363 = vrsqrt.f32 %v491_v24  ;;  %v485_v27 = vmul.f32 0.125, %v475_v25 }
 0x472   :  { %v1360_v28 = vpop.eup %1359  ;;  %v492_v29 = vadd.f32 1e-05, %v485_v27 }
 0x473   :  { %v503_v32 = vmul.f32 %v1360_v28, %v1652_v26  ;;  %v477_v33 = vpop.xlane.xlu1 %476 }
 0x474   :  { %1365 = vrsqrt.f32 %v492_v29  ;;  %v486_v34 = vmul.f32 0.125, %v477_v33 }
 0x475   :  { %v515_v36 = vmul.f32 %v930_v30, %v503_v32 }
 0x476   :  { %v1362_v37 = vpop.eup %1361  ;;  %v493_v38 = vadd.f32 1e-05, %v486_v34 }
 0x477   :  { %v479_v40 = vpop.xlane.xlu0 %478  ;;  %v527_v41 = vadd.f32 %v931_v35, %v515_v36  ;;  %v504_v42 = vmul.f32 %v1362_v37, %v1656_v4  ;;  %v779_v37 = vld [vmem:[#allocation5 + $0x180] sm:$0xff] }
 0x478   :  { %1367 = vrsqrt.f32 %v493_v38  ;;  %v487_v43 = vmul.f32 0.125, %v479_v40  ;;  %v780_v38 = vld [vmem:[#allocation5 + $0x188] sm:$0xff]  ;;  %v781_v40 = vld [vmem:[#allocation5 + $0x190] sm:$0xff] }
 0x479   :  { %v534_v45 = vmax.f32 %v527_v41, 0.0  ;;  %v516_v18 = vmul.f32 %v930_v30, %v504_v42  ;;  %v1313_v41 = vpack.c.bf16 %v780_v38, %v779_v37  ;;  %v782_v42 = vld [vmem:[#allocation5 + $0x198] sm:$0xff] }
 0x47a   :  { %v1364_v46 = vpop.eup %1363  ;;  %v494_v47 = vadd.f32 1e-05, %v487_v43  ;;  %v1316_v43 = vpack.c.bf16 %v782_v42, %v781_v40 }
 0x47b   :  { %1167 = vmatmul.mubr.f32.vlgmr.msra.gmra.mrb[14].mxu0 %v534_v45  ;;  %v481_v48 = vpop.xlane.xlu1 %480  ;;  %v528_v26 = vadd.f32 %v931_v35, %v516_v18  ;;  %v505_v49 = vmul.f32 %v1364_v46, %v1660_v8  ;;  %1314 = vmatpush3.bf16.msra.mxu1 %v1313_v41 }
 0x47c   :  { %1369 = vrsqrt.f32 %v494_v47  ;;  %v488_v23 = vmul.f32 0.125, %v481_v48  ;;  %1169 = vmatprep.mubr.msk.f32.mxu0 %vm1487_vm0, %v1488_v1  ;;  %1315 = vmatprep.subr.bf16.mxu1 %v1486_v0 }
 0x47d   :  { %v535_v51 = vmax.f32 %v528_v26, 0.0  ;;  %v517_v52 = vmul.f32 %v930_v30, %v505_v49 }
 0x47e   :  { %v1366_v31 = vpop.eup %1365  ;;  %v495_v4 = vadd.f32 1e-05, %v488_v23 }
 0x47f   :  { %1170 = vmatmul.mubr.f32.gmra.mrb[16].mxu0 %v535_v51  ;;  %v529_v53 = vadd.f32 %v931_v35, %v517_v52  ;;  %v506_v54 = vmul.f32 %v1366_v31, %v1664_v13  ;;  %1317 = vmatpush3.bf16.msra.mxu1 %v1316_v43 }
 0x480   :  { %1371 = vrsqrt.f32 %v495_v4  ;;  %1172 = vmatprep.mubr.msk.f32.mxu0 %vm1487_vm0, %v1488_v1  ;;  %1318 = vmatprep.subr.bf16.mxu1 %v1486_v0 }
 0x481   :  { %v536_v55 = vmax.f32 %v529_v53, 0.0  ;;  %v518_v56 = vmul.f32 %v930_v30, %v506_v54 }
 0x482   :  { %v1368_v8 = vpop.eup %1367 }
 0x483   :  { %1173 = vmatmul.mubr.f32.gmra.mrb[18].mxu0 %v536_v55  ;;  %v530_v57 = vadd.f32 %v931_v35, %v518_v56  ;;  %v507_v58 = vmul.f32 %v1368_v8, %v1668_v44 }
 0x484   :  { %1175 = vmatprep.mubr.msk.f32.mxu0 %vm1487_vm0, %v1488_v1 }
 0x485   :  { %v537_v59 = vmax.f32 %v530_v57, 0.0  ;;  %v519_v60 = vmul.f32 %v930_v30, %v507_v58 }
 0x486   :  { %v1370_v61 = vpop.eup %1369 }
 0x487   :  { %1176 = vmatmul.mubr.f32.gmra.mrb[20].mxu0 %v537_v59  ;;  %v531_v62 = vadd.f32 %v931_v35, %v519_v60  ;;  %v508_v13 = vmul.f32 %v1370_v61, %v1672_v50 }
 0x488   :  { %1178 = vmatprep.mubr.msk.f32.mxu0 %vm1487_vm0, %v1488_v1 }
 0x489   :  { %v538_v63 = vmax.f32 %v531_v62, 0.0  ;;  %v520_v2 = vmul.f32 %v930_v30, %v508_v13 }
 0x48a   :  { %v1372_v5 = vpop.eup %1371 }
 0x48b   :  { %1179 = vmatmul.mubr.f32.gmra.mrb[22].mxu0 %v538_v63  ;;  %v532_v6 = vadd.f32 %v931_v35, %v520_v2  ;;  %v509_v44 = vmul.f32 %v1372_v5, %v1677_v39  ;;  %v783_v63 = vld [vmem:[#allocation5 + $0x1a0] sm:$0xff]  ;;  %v784_v2 = vld [vmem:[#allocation5 + $0x1a8] sm:$0xff] }
 0x48c   :  { %1181 = vmatprep.mubr.msk.f32.mxu0 %vm1487_vm0, %v1488_v1 }
 0x48d   :  { %v539_v7 = vmax.f32 %v532_v6, 0.0  ;;  %v521_v9 = vmul.f32 %v930_v30, %v509_v44  ;;  %v1319_v44 = vpack.c.bf16 %v784_v2, %v783_v63 }
 0x48f   :  { %1182 = vmatmul.mubr.f32.gmra.mrb[24].mxu0 %v539_v7  ;;  %v533_v10 = vadd.f32 %v931_v35, %v521_v9  ;;  %1320 = vmatpush3.bf16.msra.mxu1 %v1319_v44 }
 0x490   :  { %1184 = vmatprep.mubr.msk.f32.mxu0 %vm1487_vm0, %v1488_v1  ;;  %1321 = vmatprep.subr.bf16.mxu1 %v1486_v0 }
 0x491   :  { %v540_v50 = vmax.f32 %v533_v10, 0.0 }
 0x493   :  { %1185 = vmatmul.mubr.f32.gmra.mrb[26].mxu0 %v540_v50  ;;  %v785_v50 = vld [vmem:[#allocation5 + $0x1b0] sm:$0xff] }
 0x54e   :  { %v629_v12 = vpop.f32.mrb[14].mxu0 }
 0x54f   :  { %v630_v14 = vadd.f32 %v932_v11, %v629_v12  ;;  %v1168_v15 = vpop.f32.mrb[15].mxu0 }
 0x551   :  { %663 = vadd.xlane.f32.xlu0 %v630_v14 }
 0x552   :  { %v634_v16 = vpop.f32.mrb[16].mxu0 }
 0x553   :  { %v635_v17 = vadd.f32 %v932_v11, %v634_v16  ;;  %v1171_v39 = vpop.f32.mrb[17].mxu0 }
 0x554   :  { %v787_v39 = vld [vmem:[#allocation5 + $0x1c0] sm:$0xff] }
 0x555   :  { %665 = vadd.xlane.f32.xlu1 %v635_v17 }
 0x556   :  { %v639_v19 = vpop.f32.mrb[18].mxu0 }
 0x557   :  { %v640_v20 = vadd.f32 %v932_v11, %v639_v19  ;;  %v1174_v21 = vpop.f32.mrb[19].mxu0  ;;  %v788_v19 = vld [vmem:[#allocation5 + $0x1c8] sm:$0xff] }
 0x558   :  { %v1325_v21 = vpack.c.bf16 %v788_v19, %v787_v39 }
 0x559   :  { %667 = vadd.xlane.f32.xlu0 %v640_v20 }
 0x55a   :  { %v644_v22 = vpop.f32.mrb[20].mxu0 }
 0x55b   :  { %v645_v24 = vadd.f32 %v932_v11, %v644_v22  ;;  %v1177_v25 = vpop.f32.mrb[21].mxu0 }
 0x55c   :  { %v790_v25 = vld [vmem:[#allocation5 + $0x1d8] sm:$0xff] }
 0x55d   :  { %669 = vadd.xlane.f32.xlu1 %v645_v24 }
 0x55e   :  { %v649_v27 = vpop.f32.mrb[22].mxu0 }
 0x55f   :  { %v650_v28 = vadd.f32 %v932_v11, %v649_v27  ;;  %v1180_v29 = vpop.f32.mrb[23].mxu0 }
 0x560   :  { %v792_v29 = vld [vmem:[#allocation5 + $0x1e8] sm:$0xff] }
 0x561   :  { %671 = vadd.xlane.f32.xlu0 %v650_v28 }
 0x562   :  { %v654_v30 = vpop.f32.mrb[24].mxu0 }
 0x563   :  { %v655_v32 = vadd.f32 %v932_v11, %v654_v30  ;;  %v1183_v33 = vpop.f32.mrb[25].mxu0 }
 0x565   :  { %673 = vadd.xlane.f32.xlu1 %v655_v32 }
 0x566   :  { %v659_v34 = vpop.f32.mrb[26].mxu0 }
 0x567   :  { %v660_v35 = vadd.f32 %v932_v11, %v659_v34  ;;  %v1186_v36 = vpop.f32.mrb[27].mxu0  ;;  %v786_v11 = vld [vmem:[#allocation5 + $0x1b8] sm:$0xff] }
 0x568   :  { %v1322_v15 = vpack.c.bf16 %v786_v11, %v785_v50 }
 0x569   :  { %675 = vadd.xlane.f32.xlu0 %v660_v35 }
 0x56a   :  { %1323 = vmatpush3.bf16.msra.mxu1 %v1322_v15 }
 0x56b   :  { %1324 = vmatprep.subr.bf16.mxu1 %v1486_v0 }
 0x56e   :  { %1326 = vmatpush3.bf16.msra.mxu1 %v1325_v21 }
 0x56f   :  { %1327 = vmatprep.subr.bf16.mxu1 %v1486_v0 }
 0x5de   :  { %v664_v45 = vpop.xlane.xlu0 %663 }
 0x5df   :  { %v677_v18 = vmul.f32 0.125, %v664_v45 }
 0x5e1   :  { %v1706_v46 = vsub.f32 %v630_v14, %v677_v18 }
 0x5e2   :  { %v666_v47 = vpop.xlane.xlu1 %665 }
 0x5e3   :  { %v678_v48 = vmul.f32 0.125, %v666_v47  ;;  %v691_v26 = vmul.f32 %v1593_v3, %v1706_v46 }
 0x5e5   :  { %v1710_v49 = vsub.f32 %v635_v17, %v678_v48  ;;  %v698_v23 = vmul.f32 %v691_v26, %v691_v26  ;;  %v933_v48 = vld [vmem:[#allocation7 + $0x7] ss:$0 sm:$0xff] }
 0x5e6   :  { %v668_v51 = vpop.xlane.xlu0 %667 }
 0x5e7   :  { %v679_v52 = vmul.f32 0.125, %v668_v51  ;;  %705 = vadd.xlane.f32.xlu1 %v698_v23  ;;  %v692_v31 = vmul.f32 %v1593_v3, %v1710_v49 }
 0x5e9   :  { %v1714_v4 = vsub.f32 %v640_v20, %v679_v52  ;;  %v699_v53 = vmul.f32 %v692_v31, %v692_v31  ;;  %v934_v52 = vld [vmem:[#allocation7 + $0x8] ss:$0 sm:$0xff] }
 0x5ea   :  { %v670_v54 = vpop.xlane.xlu1 %669 }
 0x5eb   :  { %v680_v55 = vmul.f32 0.125, %v670_v54  ;;  %707 = vadd.xlane.f32.xlu0 %v699_v53  ;;  %v693_v56 = vmul.f32 %v1593_v3, %v1714_v4 }
 0x5ed   :  { %v1718_v8 = vsub.f32 %v645_v24, %v680_v55  ;;  %v700_v57 = vmul.f32 %v693_v56, %v693_v56  ;;  %v789_v24 = vld [vmem:[#allocation5 + $0x1d0] sm:$0xff] }
 0x5ee   :  { %v672_v58 = vpop.xlane.xlu0 %671  ;;  %v1328_v27 = vpack.c.bf16 %v790_v25, %v789_v24 }
 0x5ef   :  { %v681_v59 = vmul.f32 0.125, %v672_v58  ;;  %709 = vadd.xlane.f32.xlu1 %v700_v57  ;;  %v694_v60 = vmul.f32 %v1593_v3, %v1718_v8 }
 0x5f0   :  { %1329 = vmatpush3.bf16.msra.mxu1 %v1328_v27 }
 0x5f1   :  { %v1722_v61 = vsub.f32 %v650_v28, %v681_v59  ;;  %v701_v62 = vmul.f32 %v694_v60, %v694_v60  ;;  %1330 = vmatprep.subr.bf16.mxu1 %v1486_v0  ;;  %v791_v28 = vld [vmem:[#allocation5 + $0x1e0] sm:$0xff] }
 0x5f2   :  { %v674_v13 = vpop.xlane.xlu1 %673  ;;  %v1331_v30 = vpack.c.bf16 %v792_v29, %v791_v28 }
 0x5f3   :  { %v682_v5 = vmul.f32 0.125, %v674_v13  ;;  %711 = vadd.xlane.f32.xlu0 %v701_v62  ;;  %v695_v6 = vmul.f32 %v1593_v3, %v1722_v61 }
 0x5f4   :  { %1332 = vmatpush3.bf16.msra.mxu1 %v1331_v30  ;;  %v935_v30 = vld [vmem:[#allocation7 + $0x9] ss:$0 sm:$0xff] }
 0x5f5   :  { %v1726_v7 = vsub.f32 %v655_v32, %v682_v5  ;;  %v702_v9 = vmul.f32 %v695_v6, %v695_v6  ;;  %1333 = vmatprep.subr.bf16.mxu1 %v1486_v0  ;;  %v793_v32 = vld [vmem:[#allocation5 + $0x1f0] sm:$0xff] }
 0x5f6   :  { %v676_v10 = vpop.xlane.xlu0 %675 }
 0x5f7   :  { %v683_v12 = vmul.f32 0.125, %v676_v10  ;;  %713 = vadd.xlane.f32.xlu1 %v702_v9  ;;  %v696_v14 = vmul.f32 %v1593_v3, %v1726_v7 }
 0x5f9   :  { %v1731_v16 = vsub.f32 %v660_v35, %v683_v12  ;;  %v703_v17 = vmul.f32 %v696_v14, %v696_v14 }
 0x5fb   :  { %715 = vadd.xlane.f32.xlu0 %v703_v17  ;;  %v697_v20 = vmul.f32 %v1593_v3, %v1731_v16  ;;  %v794_v3 = vld [vmem:[#allocation5 + $0x1f8] sm:$0xff] }
 0x5fc   :  { %v1334_v33 = vpack.c.bf16 %v794_v3, %v793_v32 }
 0x5fd   :  { %v704_v22 = vmul.f32 %v697_v20, %v697_v20 }
 0x5fe   :  { %1335 = vmatpush3.bf16.msra.mxu1 %v1334_v33 }
 0x5ff   :  { %717 = vadd.xlane.f32.xlu1 %v704_v22 }
 0x674   :  { %v706_v34 = vpop.xlane.xlu1 %705 }
 0x675   :  { %v719_v35 = vmul.f32 0.125, %v706_v34 }
 0x677   :  { %v726_v36 = vadd.f32 1e-05, %v719_v35 }
 0x678   :  { %v708_v37 = vpop.xlane.xlu0 %707 }
 0x679   :  { %1373 = vrsqrt.f32 %v726_v36  ;;  %v720_v38 = vmul.f32 0.125, %v708_v37 }
 0x67b   :  { %v727_v40 = vadd.f32 1e-05, %v720_v38 }
 0x67c   :  { %v710_v41 = vpop.xlane.xlu1 %709 }
 0x67d   :  { %1375 = vrsqrt.f32 %v727_v40  ;;  %v721_v42 = vmul.f32 0.125, %v710_v41 }
 0x67f   :  { %v728_v43 = vadd.f32 1e-05, %v721_v42 }
 0x680   :  { %v712_v45 = vpop.xlane.xlu0 %711 }
 0x681   :  { %1377 = vrsqrt.f32 %v728_v43  ;;  %v722_v18 = vmul.f32 0.125, %v712_v45 }
 0x683   :  { %v1374_v47 = vpop.eup %1373  ;;  %v729_v0 = vadd.f32 1e-05, %v722_v18 }
 0x684   :  { %v740_v26 = vmul.f32 %v1374_v47, %v1706_v46  ;;  %v714_v23 = vpop.xlane.xlu1 %713 }
 0x685   :  { %1379 = vrsqrt.f32 %v729_v0  ;;  %v723_v51 = vmul.f32 0.125, %v714_v23 }
 0x686   :  { %v752_v31 = vmul.f32 %v933_v48, %v740_v26 }
 0x687   :  { %v1376_v53 = vpop.eup %1375  ;;  %v730_v54 = vadd.f32 1e-05, %v723_v51 }
 0x688   :  { %v716_v55 = vpop.xlane.xlu0 %715  ;;  %v764_v56 = vadd.f32 %v934_v52, %v752_v31  ;;  %v741_v57 = vmul.f32 %v1376_v53, %v1710_v49 }
 0x689   :  { %1381 = vrsqrt.f32 %v730_v54  ;;  %v724_v58 = vmul.f32 0.125, %v716_v55 }
 0x68a   :  { %v771_v59 = vmax.f32 %v764_v56, 0.0  ;;  %v753_v60 = vmul.f32 %v933_v48, %v741_v57 }
 0x68b   :  { %v1378_v62 = vpop.eup %1377  ;;  %v731_v13 = vadd.f32 1e-05, %v724_v58 }
 0x68c   :  { %1220 = vmatmul.mubr.f32.vlgmr.msra.gmra.mrb[14].mxu1 %v771_v59  ;;  %v718_v63 = vpop.xlane.xlu1 %717  ;;  %v765_v46 = vadd.f32 %v934_v52, %v753_v60  ;;  %v742_v2 = vmul.f32 %v1378_v62, %v1714_v4 }
 0x68d   :  { %1383 = vrsqrt.f32 %v731_v13  ;;  %v725_v5 = vmul.f32 0.125, %v718_v63  ;;  %1222 = vmatprep.mubr.msk.f32.mxu1 %vm1487_vm0, %v1488_v1 }
 0x68e   :  { %v772_v6 = vmax.f32 %v765_v46, 0.0  ;;  %v754_v44 = vmul.f32 %v933_v48, %v742_v2 }
 0x68f   :  { %v1380_v9 = vpop.eup %1379  ;;  %v732_v49 = vadd.f32 1e-05, %v725_v5 }
 0x690   :  { %1223 = vmatmul.mubr.f32.gmra.mrb[16].mxu1 %v772_v6  ;;  %v766_v10 = vadd.f32 %v934_v52, %v754_v44  ;;  %v743_v50 = vmul.f32 %v1380_v9, %v1718_v8 }
 0x691   :  { %1385 = vrsqrt.f32 %v732_v49  ;;  %1225 = vmatprep.mubr.msk.f32.mxu1 %vm1487_vm0, %v1488_v1 }
 0x692   :  { %v773_v11 = vmax.f32 %v766_v10, 0.0  ;;  %v755_v12 = vmul.f32 %v933_v48, %v743_v50 }
 0x693   :  { %v1382_v4 = vpop.eup %1381 }
 0x694   :  { %1226 = vmatmul.mubr.f32.gmra.mrb[18].mxu1 %v773_v11  ;;  %v767_v14 = vadd.f32 %v934_v52, %v755_v12  ;;  %v744_v15 = vmul.f32 %v1382_v4, %v1722_v61 }
 0x695   :  { %1228 = vmatprep.mubr.msk.f32.mxu1 %vm1487_vm0, %v1488_v1 }
 0x696   :  { %v774_v17 = vmax.f32 %v767_v14, 0.0  ;;  %v756_v39 = vmul.f32 %v933_v48, %v744_v15 }
 0x697   :  { %v1384_v19 = vpop.eup %1383 }
 0x698   :  { %1229 = vmatmul.mubr.f32.gmra.mrb[20].mxu1 %v774_v17  ;;  %v768_v20 = vadd.f32 %v934_v52, %v756_v39  ;;  %v745_v8 = vmul.f32 %v1384_v19, %v1726_v7 }
 0x699   :  { %1231 = vmatprep.mubr.msk.f32.mxu1 %vm1487_vm0, %v1488_v1 }
 0x69a   :  { %v775_v21 = vmax.f32 %v768_v20, 0.0  ;;  %v757_v22 = vmul.f32 %v933_v48, %v745_v8 }
 0x69b   :  { %v1386_v24 = vpop.eup %1385 }
 0x69c   :  { %1232 = vmatmul.mubr.f32.gmra.mrb[22].mxu1 %v775_v21  ;;  %v769_v25 = vadd.f32 %v934_v52, %v757_v22  ;;  %v746_v61 = vmul.f32 %v1386_v24, %v1731_v16 }
 0x69d   :  { %1234 = vmatprep.mubr.msk.f32.mxu1 %vm1487_vm0, %v1488_v1 }
 0x69e   :  { %v776_v27 = vmax.f32 %v769_v25, 0.0  ;;  %v758_v28 = vmul.f32 %v933_v48, %v746_v61 }
 0x6a0   :  { %1235 = vmatmul.mubr.f32.gmra.mrb[24].mxu1 %v776_v27  ;;  %v770_v29 = vadd.f32 %v934_v52, %v758_v28 }
 0x6a1   :  { %1237 = vmatprep.mubr.msk.f32.mxu1 %vm1487_vm0, %v1488_v1 }
 0x6a2   :  { %v777_v7 = vmax.f32 %v770_v29, 0.0 }
 0x6a4   :  { %1238 = vmatmul.mubr.f32.gmra.mrb[26].mxu1 %v777_v7 }
 0x75f   :  { %v866_v32 = vpop.f32.mrb[14].mxu1 }
 0x760   :  { %v867_v3 = vadd.f32 %v935_v30, %v866_v32  ;;  %v1221_v33 = vpop.f32.mrb[15].mxu1 }
 0x762   :  { %900 = vst [vmem:[#allocation8] sm:$0xff] %v867_v3 }
 0x763   :  { %v871_v34 = vpop.f32.mrb[16].mxu1 }
 0x764   :  { %v872_v35 = vadd.f32 %v935_v30, %v871_v34  ;;  %v1224_v16 = vpop.f32.mrb[17].mxu1 }
 0x766   :  { %901 = vst [vmem:[#allocation8 + $0x8] sm:$0xff] %v872_v35 }
 0x767   :  { %v876_v36 = vpop.f32.mrb[18].mxu1 }
 0x768   :  { %v877_v37 = vadd.f32 %v935_v30, %v876_v36  ;;  %v1227_v38 = vpop.f32.mrb[19].mxu1 }
 0x76a   :  { %902 = vst [vmem:[#allocation8 + $0x10] sm:$0xff] %v877_v37 }
 0x76b   :  { %v881_v40 = vpop.f32.mrb[20].mxu1 }
 0x76c   :  { %v882_v41 = vadd.f32 %v935_v30, %v881_v40  ;;  %v1230_v42 = vpop.f32.mrb[21].mxu1 }
 0x76e   :  { %903 = vst [vmem:[#allocation8 + $0x18] sm:$0xff] %v882_v41 }
 0x76f   :  { %v886_v1 = vpop.f32.mrb[22].mxu1 }
 0x770   :  { %v887_v43 = vadd.f32 %v935_v30, %v886_v1  ;;  %v1233_v45 = vpop.f32.mrb[23].mxu1 }
 0x772   :  { %904 = vst [vmem:[#allocation8 + $0x20] sm:$0xff] %v887_v43 }
 0x773   :  { %v891_v18 = vpop.f32.mrb[24].mxu1 }
 0x774   :  { %v892_v47 = vadd.f32 %v935_v30, %v891_v18  ;;  %v1236_v0 = vpop.f32.mrb[25].mxu1 }
 0x776   :  { %905 = vst [vmem:[#allocation8 + $0x28] sm:$0xff] %v892_v47 }
 0x777   :  { %v896_v48 = vpop.f32.mrb[26].mxu1 }
 0x778   :  { %v897_v26 = vadd.f32 %v935_v30, %v896_v48  ;;  %v1239_v23 = vpop.f32.mrb[27].mxu1 }
 0x77a   :  { %906 = vst [vmem:[#allocation8 + $0x30] sm:$0xff] %v897_v26 }
 0x77b   :  { %1464 = shalt.err (!%p1461_p0)
}
 0x77c   :  { %s1465_s27 = scalar_lea.hbm %s1776_s3, 896 }
 0x77d   :  { %p1466_p1 = scmp.ne.s32.totalorder %s1776_s3, %s1465_s27  ;;  %p1469_p2 = scmp.lt.u32.totalorder %s1465_s27, %s1776_s3 }
 0x77f   :  { %p1471_p3 = pnand %p1469_p2, %p1466_p1 }
 0x781   :  { %1474 = shalt.err (!%p1471_p3)
}
 0x782   :  { %918 = dma.vmem_to_hbm [thread:$0]  %s913_s21, 896, %s1776_s3, [#allocation4], %s1483_s24, %s1483_s24, %s1484_s25  }
 0x783   :  { %1479 = dma.done.wait [#allocation4], 896  }
 0x784   :  { %1480 = vsyncadd [#allocation4], 4294966400 }
 0x785   :  { %922 = vsyncpa [#allocation3], 1 }
 0x786   :  { %923 = vsyncpa [#allocation6], 1 }
 0x787   :  { %924 = vsyncpa [#allocation4], 1 }

</bundles_post_ra>
